<compile_context>
chip_gen: v6e
topology: v6e:2x2x1
jax: 0.10.0
libtpu: 0.0.40
codegen_flags: <defaults>
</compile_context>

<pallas_src>
import functools

import jax
import jax.numpy as jnp
from jax.experimental import pallas as pl
from jax.experimental.pallas import tpu as pltpu


def _kl_kernel(y_ref, p_ref, out_ref, *, inv_temperature, n_rows, tile_n, mask_tail):
    """One grid step = tile_n rows. Inner loop walks 8-row chunks, computes
    log_softmax(y/T) and p*(log p - log_softmax), and accumulates a lane-dense
    (8, C) partial that is summed (tiny) outside the kernel."""
    c = y_ref.shape[-1]
    inv_t = jnp.float32(inv_temperature)
    tiny = jnp.float32(jnp.finfo(jnp.float32).tiny)
    row0 = pl.program_id(0) * tile_n

    def chunk_contrib(j):
        start = pl.multiple_of(j * 8, 8)
        y = y_ref[pl.ds(start, 8), :].astype(jnp.float32) * inv_t
        # Numerically stable log_softmax along the class (lane) axis.
        m = jnp.max(y, axis=-1, keepdims=True)
        z = y - m
        lse = jnp.log(jnp.sum(jnp.exp(z), axis=-1, keepdims=True))
        log_p_s = z - lse
        p = p_ref[pl.ds(start, 8), :].astype(jnp.float32)
        # PyTorch kl_div pointwise: xlogy(p, p) - p * input, with 0*log0 := 0.
        # Single safe log: p == 0 rows contribute exactly 0 (0 * finite).
        contrib = p * (jnp.log(jnp.maximum(p, tiny)) - log_p_s)
        if mask_tail:
            # Ragged tail: rows past N hold unspecified VMEM — zero them out.
            rows = row0 + start + jax.lax.broadcasted_iota(jnp.int32, (8, 1), 0)
            contrib = jnp.where(rows < n_rows, contrib, 0.0)
        return contrib

    def body(j, acc):
        return acc + chunk_contrib(j)

    if mask_tail:
        # Skip chunks that are entirely past the end of the batch.
        n_chunks = (jnp.minimum(tile_n, n_rows - row0) + 7) // 8
    else:
        n_chunks = tile_n // 8

    acc = jax.lax.fori_loop(0, n_chunks, body, jnp.zeros((8, c), jnp.float32))
    out_ref[...] = acc


def _vmem_capacity_bytes():
    try:
        return int(pltpu.get_tpu_info().vmem_capacity_bytes)
    except Exception:
        return 64 * 1024 * 1024  # conservative (v7x per-TC figure)


def _pick_tile_n(n, c, in_itemsize, vmem_capacity_bytes):
    """Row-tile size: as large as the (generation-aware) VMEM budget allows —
    temporaries are bounded by the chunked inner loop, so only the
    double-buffered input tiles matter — while keeping >=2 tiles for v7x's two
    TensorCores when each half is still worth the per-step overhead."""
    budget = max(8 * 1024 * 1024, vmem_capacity_bytes // 4)
    per_row = c * 2 * 2 * in_itemsize          # 2 inputs x 2 pipeline buffers
    fixed = 4 * 8 * c * 4                      # (8,C) acc + double-buffered out
    t = max(8, ((budget - fixed) // max(per_row, 1)) // 8 * 8)
    t = min(t, 8192)
    n_pad8 = -(-n // 8) * 8
    t = min(t, n_pad8)
    if n > 8:
        half = -(-((n + 1) // 2) // 8) * 8     # ceil(N/2), 8-aligned
        if half * c * 2 * in_itemsize >= 256 * 1024:   # only if halves stay chunky
            t = min(t, half)
    return int(t)
    # TODO(synk): for very large C (~100k+ classes) add a second grid axis over
    # C with an online logsumexp ("arbitrary" inner axis); this kernel assumes a
    # full class row fits comfortably in VMEM.


def kl_loss(y_s, p_t, temperature, *, tile_n=None):
    """Equivalent of KL(T).forward(y_s, p_t) from the PyTorch module.

    bf16 inputs are the recommended calling convention (kernel upcasts to f32);
    this halves HBM traffic, which is the binding resource on v5e."""
    N, C = y_s.shape
    assert p_t.shape == (N, C)

    in_itemsize = jnp.dtype(y_s.dtype).itemsize
    vmem_cap = _vmem_capacity_bytes()
    if tile_n is None:
        tile_n = _pick_tile_n(N, C, in_itemsize, vmem_cap)
    assert tile_n >= 8 and tile_n % 8 == 0

    num_tiles = pl.cdiv(N, tile_n)
    mask_tail = (N % tile_n) != 0

    kernel = functools.partial(
        _kl_kernel,
        inv_temperature=1.0 / float(temperature),
        n_rows=N,
        tile_n=tile_n,
        mask_tail=mask_tail,
    )

    # Explicit scoped-VMEM limit (default is 16/32 MiB; budget above may exceed it).
    need = tile_n * C * 2 * 2 * in_itemsize + 4 * 8 * C * 4
    vmem_limit = int(min(vmem_cap * 3 // 4, max(48 * 1024 * 1024, 2 * need)))

    cost = pl.CostEstimate(
        flops=10 * N * C,
        transcendentals=2 * N * C,
        bytes_accessed=int(2 * N * C * in_itemsize + 8 * num_tiles * C * 4),
    )

    partials = pl.pallas_call(
        kernel,
        out_shape=jax.ShapeDtypeStruct((8 * num_tiles, C), jnp.float32),
        grid=(num_tiles,),
        in_specs=[
            pl.BlockSpec((tile_n, C), lambda i: (i, 0)),
            pl.BlockSpec((tile_n, C), lambda i: (i, 0)),
        ],
        out_specs=pl.BlockSpec((8, C), lambda i: (i, 0)),
        compiler_params=pltpu.CompilerParams(
            dimension_semantics=("parallel",),   # independent tiles -> megacore-friendly
            vmem_limit_bytes=vmem_limit,
        ),
        cost_estimate=cost,
    )(y_s, p_t)

    # loss = kl_div(log_softmax(y_s/T), p_t, sum) * T^2 / batch_size
    return jnp.sum(partials) * jnp.float32(temperature) ** 2 / jnp.float32(N)


def _kl_loss_ref(y_s, p_t, temperature):
    """Plain-JAX reference mirroring the PyTorch semantics."""
    log_p_s = jax.nn.log_softmax(y_s.astype(jnp.float32) / temperature, axis=1)
    p = p_t.astype(jnp.float32)
    pointwise = jnp.where(p > 0, p * (jnp.log(jnp.where(p > 0, p, 1.0)) - log_p_s), 0.0)
    return jnp.sum(pointwise) * temperature ** 2 / y_s.shape[0]


if __name__ == "__main__":
    T = 4.0
    N, C = 16, 128  # small batch of student logits over 128 classes

    key = jax.random.PRNGKey(0)
    k1, k2 = jax.random.split(key)
    y_s = jax.random.normal(k1, (N, C), dtype=jnp.float32)           # student logits
    p_t = jax.nn.softmax(jax.random.normal(k2, (N, C)) / T, axis=1)  # teacher probs

    loss = kl_loss(y_s, p_t, T)
    jax.block_until_ready(loss)
    ref = _kl_loss_ref(y_s, p_t, T)
    assert jnp.allclose(loss, ref, rtol=1e-5, atol=1e-5), (loss, ref)

    # Ragged batch with a forced 2-tile grid: exercises the in-kernel tail mask
    # (no padding copies) and the "parallel" multi-tile path.
    y2 = jax.random.normal(k1, (13, C), dtype=jnp.float32)
    p2 = jax.nn.softmax(jax.random.normal(k2, (13, C)) / T, axis=1)
    loss2 = kl_loss(y2, p2, T, tile_n=8)
    jax.block_until_ready(loss2)
    ref2 = _kl_loss_ref(y2, p2, T)
    assert jnp.allclose(loss2, ref2, rtol=1e-5, atol=1e-5), (loss2, ref2)

    # bf16 inputs (recommended calling convention; kernel upcasts internally).
    loss3 = kl_loss(y_s.astype(jnp.bfloat16), p_t.astype(jnp.bfloat16), T)
    jax.block_until_ready(loss3)
    ref3 = _kl_loss_ref(y_s.astype(jnp.bfloat16), p_t.astype(jnp.bfloat16), T)
    assert jnp.allclose(loss3, ref3, rtol=1e-4, atol=1e-4), (loss3, ref3)

    print("KERNEL_OK")
</pallas_src>

<mosaic_0001>
module attributes {stable_mosaic.version = 11 : i64} {
  func.func @_kl_kernel(%arg0: i32, %arg1: memref<16x128xf32, #tpu.memory_space<vmem>>, %arg2: memref<16x128xf32, #tpu.memory_space<vmem>>, %arg3: memref<8x128xf32, #tpu.memory_space<vmem>>) attributes {dimension_semantics = [#tpu.dimension_semantics<parallel>], iteration_bounds = array<i64: 1>, scalar_prefetch = 0 : i64, scratch_operands = 0 : i64, tpu.core_type = #tpu.core_type<tc>, window_params = [{transform_indices = @transform_0, window_bounds = array<i64: 16, 128>}, {transform_indices = @transform_1, window_bounds = array<i64: 16, 128>}, {transform_indices = @transform_2, window_bounds = array<i64: 8, 128>}]} {
    %cst = arith.constant 0.000000e+00 : f32
    %0 = vector.broadcast %cst : f32 to vector<8x128xf32>
    %cst_0 = arith.constant 2.500000e-01 : f32
    %cst_1 = arith.constant 1.17549435E-38 : f32
    %c0_i32 = arith.constant 0 : i32
    %c2_i32 = arith.constant 2 : i32
    %1 = arith.addi %c0_i32, %c2_i32 : i32
    %c1_i32 = arith.constant 1 : i32
    %2 = scf.for %arg4 = %c0_i32 to %1 step %c1_i32 iter_args(%arg5 = %0) -> (vector<8x128xf32>)  : i32 {
      %c8_i32 = arith.constant 8 : i32
      %4 = arith.muli %arg4, %c8_i32 : i32
      %5 = tpu.assume_multiple %4, 8 : i32
      %6 = arith.index_cast %5 : i32 to index
      %c0_4 = arith.constant 0 : index
      %7 = vector.load %arg1[%6, %c0_4] : memref<16x128xf32, #tpu.memory_space<vmem>>, vector<8x128xf32>
      %8 = vector.broadcast %cst_0 : f32 to vector<8x128xf32>
      %9 = arith.mulf %7, %8 : vector<8x128xf32>
      %cst_5 = arith.constant dense<0xFF800000> : vector<8xf32>
      %10 = vector.multi_reduction <maximumf>, %9, %cst_5 [1] : vector<8x128xf32> to vector<8xf32>
      %11 = vector.shape_cast %10 : vector<8xf32> to vector<8x1xf32>
      %12 = vector.broadcast %11 : vector<8x1xf32> to vector<8x128xf32>
      %13 = arith.subf %9, %12 : vector<8x128xf32>
      %14 = math.exp %13 : vector<8x128xf32>
      %cst_6 = arith.constant dense<0.000000e+00> : vector<8xf32>
      %15 = vector.multi_reduction <add>, %14, %cst_6 [1] : vector<8x128xf32> to vector<8xf32>
      %16 = vector.shape_cast %15 : vector<8xf32> to vector<8x1xf32>
      %17 = math.log %16 : vector<8x1xf32>
      %18 = vector.broadcast %17 : vector<8x1xf32> to vector<8x128xf32>
      %19 = arith.subf %13, %18 : vector<8x128xf32>
      %20 = arith.index_cast %5 : i32 to index
      %c0_7 = arith.constant 0 : index
      %21 = vector.load %arg2[%20, %c0_7] : memref<16x128xf32, #tpu.memory_space<vmem>>, vector<8x128xf32>
      %22 = vector.broadcast %cst_1 : f32 to vector<8x128xf32>
      %23 = arith.maximumf %21, %22 : vector<8x128xf32>
      %24 = math.log %23 : vector<8x128xf32>
      %25 = arith.subf %24, %19 : vector<8x128xf32>
      %26 = arith.mulf %21, %25 : vector<8x128xf32>
      %27 = arith.addf %arg5, %26 : vector<8x128xf32>
      scf.yield %27 : vector<8x128xf32>
    }
    %c2_i32_2 = arith.constant 2 : i32
    %c0 = arith.constant 0 : index
    %c0_3 = arith.constant 0 : index
    %3 = vector.load %arg3[%c0, %c0_3] : memref<8x128xf32, #tpu.memory_space<vmem>>, vector<8x128xf32>
    tpu.vector_store %arg3[%c0, %c0_3], %2 {strides = array<i32>} : memref<8x128xf32, #tpu.memory_space<vmem>>, vector<8x128xf32>,
    return
  }
  func.func @transform_0(%arg0: i32) -> (i32, i32) {
    %c0_i32 = arith.constant 0 : i32
    %c0_i32_0 = arith.constant 0 : i32
    return %arg0, %c0_i32 : i32, i32
  }
  func.func @transform_1(%arg0: i32) -> (i32, i32) {
    %c0_i32 = arith.constant 0 : i32
    %c0_i32_0 = arith.constant 0 : i32
    return %arg0, %c0_i32 : i32, i32
  }
  func.func @transform_2(%arg0: i32) -> (i32, i32) {
    %c0_i32 = arith.constant 0 : i32
    %c0_i32_0 = arith.constant 0 : i32
    return %arg0, %c0_i32 : i32, i32
  }
}

</mosaic_0001>

<bundles_post_ra>
// kernel: tpu_custom_call.1
= control target key start
LH: loop header
LB: loop body
LE: loop exit
PB: predicated region body
PF: predicated region fallthrough
CT: control target
= control target key end

     0   :  { %7 = vsyncpa [#allocation3], 0  ;;  %s246_s0 = inlined_call_operand.hbm [shape: f32[16,128], index: 0, kind: input, shape index: {}]   ;;  %s247_s1 = inlined_call_operand.hbm [shape: f32[16,128], index: 1, kind: input, shape index: {}]   ;;  %s248_s2 = inlined_call_operand.hbm [shape: f32[8,128], index: 2, kind: output, shape index: {}]  }
   0x1   :  { %8 = vsyncpa [#allocation6], 0 }
   0x2   :  { %9 = vsyncpa [#allocation4], 0  ;;  %s208_s9 = smov [#allocation2]  }
   0x3   :  { %s15_s10 = sshll.u32 %s208_s9, 4  ;;  %s16_s10 = int_to_ptr.vmem [resolvable:$true] %s15_s10 }
   0x4   :  { %s134_s11 = scalar_lea.vmem %s16_s10, 256  ;;  %p139_p1 = scmp.lt.s32.totalorder %s16_s10, %s16_s10 }
   0x5   :  { %p135_p0 = scmp.ne.s32.totalorder %s16_s10, %s134_s11  ;;  %p140_p2 = scmp.lt.s32.totalorder %s134_s11, %s134_s11 }
   0x7   :  { %p141_p3 = por %p140_p2, %p139_p1 }
   0x9   :  { %p142_p4 = pnand %p141_p3, %p135_p0 }
   0xb   :  { %145 = shalt.err (!%p142_p4)
}
   0xc   :  { %s209_s12 = smov 128   ;;  %s210_s13 = smov 8  }
   0xd   :  { %21 = dma.hbm_to_vmem [thread:$0]  %s246_s0, 256, %s16_s10, [#allocation3], %s209_s12, %s209_s12, %s210_s13  }
   0xe   :  { %s211_s16 = smov [#allocation5]  }
   0xf   :  { %s27_s17 = sshll.u32 %s211_s16, 4  ;;  %s28_s17 = int_to_ptr.vmem [resolvable:$true] %s27_s17 }
  0x10   :  { %s154_s18 = scalar_lea.vmem %s28_s17, 256  ;;  %p159_p6 = scmp.lt.s32.totalorder %s28_s17, %s28_s17 }
  0x11   :  { %p155_p5 = scmp.ne.s32.totalorder %s28_s17, %s154_s18  ;;  %p160_p7 = scmp.lt.s32.totalorder %s154_s18, %s154_s18 }
  0x13   :  { %p161_p8 = por %p160_p7, %p159_p6 }
  0x15   :  { %p162_p9 = pnand %p161_p8, %p155_p5 }
  0x17   :  { %165 = shalt.err (!%p162_p9)
}
  0x18   :  { %33 = dma.hbm_to_vmem [thread:$0]  %s247_s1, 256, %s28_s17, [#allocation6], %s209_s12, %s209_s12, %s210_s13  }
  0x19   :  { %194 = dma.done.wait [#allocation3], 256  }
  0x1a   :  { %195 = vsyncadd [#allocation3], 4294967040 }
  0x1b   :  { %196 = dma.done.wait [#allocation6], 256  }
  0x1c   :  { %197 = vsyncadd [#allocation6], 4294967040  ;;  %v200_v0 = vmov 0.0   ;;  %s234_s0 = smov 0  }
  0x1d LB: > { %s98_s21 = sshll.u32 %s206_s0, 3  ;;  %s45_s0 = sadd.s32 1, %s206_s0   ;;  %s206_s0 = sphi %s234_s0, %s45_s0   ;;  %v202_v0 = vphi %v200_v0, %v201_v0  }
  0x1e   : > { %s48_s22 = scalar_lea.vmem [#allocation2], %s98_s21  ;;  %s61_s1 = scalar_lea.vmem [#allocation5], %s98_s21 }
  0x1f   : > { %v49_v1 = vld [vmem:[%s48_s22] sm:$0xff]  ;;  %p42_p10 = scmp.ge.s32.totalorder %s45_s0, 2  }
  0x20   : > { %v50_v2 = vmul.f32 0.25, %v49_v1  ;;  %v62_v7 = vld [vmem:[%s61_s1] sm:$0xff]  ;;  %s212_s23 = smov (%p42_p10), [#allocation7]  }
  0x21   : > { %v63_v8 = vmax.f32 %v62_v7, 1.1754944e-38  ;;  %s76_s24 = sshll.u32 (%p42_p10), %s212_s23, 4  ;;  %s77_s24 = int_to_ptr.vmem [resolvable:$true] %s76_s24 }
  0x22   : > { %51 = vmax.xlane.f32.xlu0 %v50_v2  ;;  %s166_s25 = scalar_lea.vmem (%p42_p10), %s77_s24, 128  ;;  %p171_p12 = scmp.lt.s32.totalorder (%p42_p10), %s77_s24, %s77_s24 }
  0x23   :  { %p167_p11 = scmp.ne.s32.totalorder (%p42_p10), %s77_s24, %s166_s25  ;;  %p172_p13 = scmp.lt.s32.totalorder (%p42_p10), %s166_s25, %s166_s25 }
  0x25   :  { %p173_p0 = por (%p42_p10), %p172_p13, %p171_p12 }
  0x27   :  { %p174_p1 = pnand (%p42_p10), %p173_p0, %p167_p11 }
  0xab   : > { %v52_v3 = vpop.xlane.xlu0 %51 }
  0xac   : > { %v53_v4 = vsub.f32 %v50_v2, %v52_v3 }
  0xae   : > { %v54_v5 = vmul.f32 1.442695, %v53_v4 }
  0xb0   : > { %120 = vpow2.f32 %v54_v5 }
  0xb1   : > { %122 = vlog2.f32 %v63_v8 }
  0xbd   : > { %v121_v6 = vpop.eup %120 }
  0xbe   : > { %56 = vadd.xlane.f32.xlu0 %v121_v6  ;;  %v123_v10 = vpop.eup %122 }
  0xbf   : > { %v65_v12 = vmul.f32 0.6931472, %v123_v10 }
 0x147   : > { %v57_v9 = vpop.xlane.xlu0 %56 }
 0x148   : > { %124 = vlog2.f32 %v57_v9 }
 0x155   : > { %v125_v11 = vpop.eup %124 }
 0x156   : > { %v59_v13 = vmul.f32 0.6931472, %v125_v11 }
 0x158   : > { %v60_v14 = vsub.f32 %v53_v4, %v59_v13 }
 0x15a   : > { %v66_v15 = vsub.f32 %v65_v12, %v60_v14 }
 0x15c   : > { %v67_v16 = vmul.f32 %v66_v15, %v62_v7  ;;  %44 = sbr.rel (!%p42_p10) target bundleno = 29 (0x1d), region = 45 }
 0x15e   : > { %v68_v17 = vadd.f32 %v202_v0, %v67_v16  }
 0x160   : > { %v201_v0 = vmov %v68_v17   ;;  %69 = vst [vmem:[#allocation7] sm:$0xff] (%p42_p10), %v68_v17 }
 0x161   :  { %177 = shalt.err (!%p174_p1)
}
 0x162   :  { %79 = dma.vmem_to_hbm [thread:$0]  %s77_s24, 128, %s248_s2, [#allocation4]  }
 0x163   :  { %198 = dma.done.wait [#allocation4], 128  }
 0x164   :  { %199 = vsyncadd [#allocation4], 4294967168 }
 0x165   :  { %83 = vsyncpa [#allocation3], 1 }
 0x166   :  { %84 = vsyncpa [#allocation6], 1 }
 0x167   :  { %85 = vsyncpa [#allocation4], 1 }

</bundles_post_ra>
